<compile_context>
chip_gen: v5e
topology: v5e:2x2
jax: 0.10.0
libtpu: 0.0.40
codegen_flags: <defaults>
</compile_context>

<pallas_src>
import jax
import jax.numpy as jnp
from jax.experimental import pallas as pl
from jax.experimental.pallas import tpu as pltpu


def _attention_kernel(x1_ref, x2_ref, w1a_ref, w1b_ref, sel_ref, selT_ref,
                      eye_ref, b1_ref, w2_ref, b2_ref, o_ref):
    # x1_ref / x2_ref / o_ref : (Rb, HW)    rows = flattened (batch, channel), Rb = Bb*C
    # w1a_ref, w1b_ref        : (Rb, hidden) fc1 weight halves, transposed & tiled per batch row
    # sel_ref                 : (Bb, Rb)     one-hot segment-sum matrix (row r belongs to batch r//C)
    # selT_ref                : (Rb, Bb)     transpose of sel (precomputed; no in-kernel transpose)
    # eye_ref                 : (Rb, C)      tiled identity, picks channel c = r % C for row r
    # b1_ref                  : (1, hidden)
    # w2_ref                  : (hidden, C)  fc2 weight, pre-transposed
    # b2_ref                  : (1, C)
    x1 = x1_ref[...]
    x2 = x2_ref[...]

    # Global average pool over the spatial (lane) axis, per (batch, channel) row.
    m1 = jnp.mean(x1, axis=-1, keepdims=True)                     # (Rb, 1)
    m2 = jnp.mean(x2, axis=-1, keepdims=True)                     # (Rb, 1)

    # fc1 on cat([pool(x1), pool(x2)]) for every batch in the block:
    #   partial[r, j] = m1[r] * W1a[c(r), j] + m2[r] * W1b[c(r), j]   (VPU)
    #   h[b, j]       = sum_{r in batch b} partial[r, j] + b1[j]      (segment sum via one-hot dot)
    partial = m1 * w1a_ref[...] + m2 * w1b_ref[...]                # (Rb, hidden)
    h = jnp.dot(sel_ref[...], partial,
                preferred_element_type=jnp.float32) + b1_ref[...]  # (Bb, hidden)
    h = jnp.maximum(h, 0.0)                                        # ReLU

    z = jnp.dot(h, w2_ref[...],
                preferred_element_type=jnp.float32) + b2_ref[...]  # (Bb, C)
    att = jax.nn.sigmoid(z)                                        # (Bb, C)

    # Scatter the attention back to per-row scale: scale[r] = att[r // C, r % C].
    att_rows = jnp.dot(selT_ref[...], att,
                       preferred_element_type=jnp.float32)         # (Rb, C)
    scale = jnp.sum(att_rows * eye_ref[...], axis=-1, keepdims=True)  # (Rb, 1)

    # Fused output: out = x1 * attention + x2 (lane broadcast of per-row scalar).
    o_ref[...] = x1 * scale + x2


def _choose_block_batches(B, C, HW, itemsize, target_bytes, max_block_bytes):
    """Pick how many batch elements (Bb) go into one grid step.

    Preference order:
      1. per-input block fits comfortably in VMEM (<= max_block_bytes),
      2. Bb*C is a multiple of 8 (sublane-full rows) or the block covers the
         whole row axis (both are layout-legal / unpadded),
      3. grid length >= 2 so both TensorCores get work,
      4. block size close to ~target_bytes (amortizes per-step overhead).
    Bb always divides B so every block is full (no ragged tail).
    """
    per_batch = C * HW * itemsize
    divisors = [d for d in range(1, B + 1) if B % d == 0]

    def key(d):
        block = d * per_batch
        fits = block <= max_block_bytes
        sublane_ok = ((d * C) % 8 == 0) or (d == B)
        grid_ok = (B // d) >= 2
        return (0 if fits else 1,
                0 if sublane_ok else 1,
                0 if grid_ok else 1,
                abs(block - target_bytes))

    return min(divisors, key=key)


def attention_layer_pallas(x1, x2, w1, b1, w2, b2, *,
                           target_block_bytes=1 << 20,
                           max_block_bytes=6 << 20):
    """x1, x2: (B, C, H, W) float32.
    w1: (hidden, 2C), b1: (hidden,), w2: (C, hidden), b2: (C,)."""
    B, C, H, W = x1.shape
    HW = H * W
    hidden = w1.shape[0]
    c_out = w2.shape[0]
    assert w1.shape[1] == 2 * C and c_out == C and w2.shape[1] == hidden

    itemsize = jnp.dtype(x1.dtype).itemsize
    Bb = _choose_block_batches(B, C, HW, itemsize, target_block_bytes, max_block_bytes)
    Rb = Bb * C
    grid = (B // Bb,)

    # Lane-dense, sublane-full streaming layout: rows = (batch, channel), lanes = HW.
    x1f = x1.reshape(B * C, HW)
    x2f = x2.reshape(B * C, HW)

    # Tiny resident weights, pre-arranged in the wrapper (no in-kernel reshape/transpose).
    w1a_rep = jnp.tile(jnp.transpose(w1[:, :C]), (Bb, 1))          # (Rb, hidden)
    w1b_rep = jnp.tile(jnp.transpose(w1[:, C:]), (Bb, 1))          # (Rb, hidden)
    sel = jnp.repeat(jnp.eye(Bb, dtype=x1.dtype), C, axis=1)       # (Bb, Rb)
    selT = jnp.transpose(sel)                                      # (Rb, Bb)
    eye_rep = jnp.tile(jnp.eye(C, dtype=x1.dtype), (Bb, 1))        # (Rb, C)
    b1_2d = b1.reshape(1, hidden)
    w2_t = jnp.transpose(w2)                                       # (hidden, C)
    b2_2d = b2.reshape(1, c_out)

    # VMEM budget: x1 + x2 + out blocks, double-buffered, plus resident weights + slack.
    block_bytes = Rb * HW * itemsize
    weight_bytes = sum(int(a.size) * itemsize
                       for a in (w1a_rep, w1b_rep, sel, selT, eye_rep, b1_2d, w2_t, b2_2d))
    vmem_need = 3 * 2 * block_bytes + 2 * weight_bytes + (2 << 20)
    vmem_limit_bytes = int(min(max(vmem_need, 16 << 20), 56 << 20))  # stay under v7x's 64 MiB

    # Memory-bound cost hint for XLA's scheduler.
    flops = 4 * B * C * HW + 2 * B * (2 * C * hidden + hidden * C)
    cost = pl.CostEstimate(
        flops=int(flops),
        transcendentals=int(B * (hidden + C)),
        bytes_accessed=int(3 * B * C * HW * itemsize + weight_bytes),
    )

    out = pl.pallas_call(
        _attention_kernel,
        out_shape=jax.ShapeDtypeStruct((B * C, HW), x1.dtype),
        grid_spec=pltpu.PrefetchScalarGridSpec(
            num_scalar_prefetch=0,
            grid=grid,
            in_specs=[
                pl.BlockSpec((Rb, HW), lambda i: (i, 0)),          # x1 (streamed)
                pl.BlockSpec((Rb, HW), lambda i: (i, 0)),          # x2 (streamed)
                pl.BlockSpec((Rb, hidden), lambda i: (0, 0)),      # w1a_rep (resident)
                pl.BlockSpec((Rb, hidden), lambda i: (0, 0)),      # w1b_rep (resident)
                pl.BlockSpec((Bb, Rb), lambda i: (0, 0)),          # sel
                pl.BlockSpec((Rb, Bb), lambda i: (0, 0)),          # selT
                pl.BlockSpec((Rb, C), lambda i: (0, 0)),           # eye_rep
                pl.BlockSpec((1, hidden), lambda i: (0, 0)),       # b1
                pl.BlockSpec((hidden, c_out), lambda i: (0, 0)),   # w2_t
                pl.BlockSpec((1, c_out), lambda i: (0, 0)),        # b2
            ],
            out_specs=pl.BlockSpec((Rb, HW), lambda i: (i, 0)),
        ),
        compiler_params=pltpu.CompilerParams(
            dimension_semantics=("parallel",),
            vmem_limit_bytes=vmem_limit_bytes,
        ),
        cost_estimate=cost,
    )(x1f, x2f, w1a_rep, w1b_rep, sel, selT, eye_rep, b1_2d, w2_t, b2_2d)
    return out.reshape(B, C, H, W)


def _reference(x1, x2, w1, b1, w2, b2):
    """Pure-JAX reference mirroring the PyTorch forward."""
    fm = jnp.concatenate([x1, x2], axis=1)                     # (B, 2C, H, W)
    y = jnp.mean(fm, axis=(2, 3))                              # (B, 2C)
    y = jnp.maximum(y @ w1.T + b1, 0.0)                        # fc1 + ReLU
    y = jax.nn.sigmoid(y @ w2.T + b2)                          # fc2 + Sigmoid
    return x1 * y[:, :, None, None] + x2


if __name__ == "__main__":
    # Small shapes: x1, x2 each (B=2, C=4, H=16, W=16)
    # => in_planes = 2C = 8, out_planes = C = 4, reduction = 2, hidden = 2
    B, C, H, W = 2, 4, 16, 16
    in_planes = 2 * C
    out_planes = C
    reduction = 2
    hidden = out_planes // reduction

    key = jax.random.PRNGKey(0)
    k_x1, k_x2, k_w1, k_w2 = jax.random.split(key, 4)

    x1 = jax.random.normal(k_x1, (B, C, H, W), dtype=jnp.float32)
    x2 = jax.random.normal(k_x2, (B, C, H, W), dtype=jnp.float32)

    # Deterministic init mimicking make_fc: kaiming_uniform_(a=1) -> U(-sqrt(3/fan_in), +),
    # bias = 0 (per nn.init.constant_(fc.bias, 0)).
    bound1 = (3.0 / in_planes) ** 0.5
    bound2 = (3.0 / hidden) ** 0.5
    w1 = jax.random.uniform(k_w1, (hidden, in_planes), jnp.float32, -bound1, bound1)
    b1 = jnp.zeros((hidden,), jnp.float32)
    w2 = jax.random.uniform(k_w2, (out_planes, hidden), jnp.float32, -bound2, bound2)
    b2 = jnp.zeros((out_planes,), jnp.float32)

    out = attention_layer_pallas(x1, x2, w1, b1, w2, b2)
    out = jax.block_until_ready(out)

    ref = _reference(x1, x2, w1, b1, w2, b2)
    assert out.shape == (B, C, H, W)
    assert jnp.allclose(out, ref, atol=1e-5, rtol=1e-5), "mismatch vs reference"

    print("KERNEL_OK")
</pallas_src>

<mosaic_0001>
module attributes {stable_mosaic.version = 11 : i64} {
  func.func @_attention_kernel(%arg0: i32, %arg1: memref<8x256xf32, #tpu.memory_space<vmem>>, %arg2: memref<8x256xf32, #tpu.memory_space<vmem>>, %arg3: memref<8x2xf32, #tpu.memory_space<vmem>>, %arg4: memref<8x2xf32, #tpu.memory_space<vmem>>, %arg5: memref<2x8xf32, #tpu.memory_space<vmem>>, %arg6: memref<8x2xf32, #tpu.memory_space<vmem>>, %arg7: memref<8x4xf32, #tpu.memory_space<vmem>>, %arg8: memref<1x2xf32, #tpu.memory_space<vmem>>, %arg9: memref<2x4xf32, #tpu.memory_space<vmem>>, %arg10: memref<1x4xf32, #tpu.memory_space<vmem>>, %arg11: memref<8x256xf32, #tpu.memory_space<vmem>>) attributes {dimension_semantics = [#tpu.dimension_semantics<parallel>], iteration_bounds = array<i64: 1>, scalar_prefetch = 0 : i64, scratch_operands = 0 : i64, tpu.core_type = #tpu.core_type<tc>, window_params = [{transform_indices = @transform_0, window_bounds = array<i64: 8, 256>}, {transform_indices = @transform_1, window_bounds = array<i64: 8, 256>}, {pipeline_mode = #tpu.pipeline_mode<synchronous>, transform_indices = @transform_2, window_bounds = array<i64: 8, 2>}, {pipeline_mode = #tpu.pipeline_mode<synchronous>, transform_indices = @transform_3, window_bounds = array<i64: 8, 2>}, {pipeline_mode = #tpu.pipeline_mode<synchronous>, transform_indices = @transform_4, window_bounds = array<i64: 2, 8>}, {pipeline_mode = #tpu.pipeline_mode<synchronous>, transform_indices = @transform_5, window_bounds = array<i64: 8, 2>}, {pipeline_mode = #tpu.pipeline_mode<synchronous>, transform_indices = @transform_6, window_bounds = array<i64: 8, 4>}, {pipeline_mode = #tpu.pipeline_mode<synchronous>, transform_indices = @transform_7, window_bounds = array<i64: 1, 2>}, {pipeline_mode = #tpu.pipeline_mode<synchronous>, transform_indices = @transform_8, window_bounds = array<i64: 2, 4>}, {pipeline_mode = #tpu.pipeline_mode<synchronous>, transform_indices = @transform_9, window_bounds = array<i64: 1, 4>}, {transform_indices = @transform_10, window_bounds = array<i64: 8, 256>}]} {
    %c0 = arith.constant 0 : index
    %c0_0 = arith.constant 0 : index
    %0 = vector.load %arg1[%c0, %c0_0] : memref<8x256xf32, #tpu.memory_space<vmem>>, vector<8x256xf32>
    %c0_1 = arith.constant 0 : index
    %c0_2 = arith.constant 0 : index
    %1 = vector.load %arg2[%c0_1, %c0_2] : memref<8x256xf32, #tpu.memory_space<vmem>>, vector<8x256xf32>
    %cst = arith.constant dense<0.000000e+00> : vector<8xf32>
    %2 = vector.multi_reduction <add>, %0, %cst [1] : vector<8x256xf32> to vector<8xf32>
    %3 = vector.shape_cast %2 : vector<8xf32> to vector<8x1xf32>
    %cst_3 = arith.constant 2.560000e+02 : f32
    %4 = vector.broadcast %cst_3 : f32 to vector<8x1xf32>
    %5 = arith.divf %3, %4 : vector<8x1xf32>
    %cst_4 = arith.constant dense<0.000000e+00> : vector<8xf32>
    %6 = vector.multi_reduction <add>, %1, %cst_4 [1] : vector<8x256xf32> to vector<8xf32>
    %7 = vector.shape_cast %6 : vector<8xf32> to vector<8x1xf32>
    %cst_5 = arith.constant 2.560000e+02 : f32
    %8 = vector.broadcast %cst_5 : f32 to vector<8x1xf32>
    %9 = arith.divf %7, %8 : vector<8x1xf32>
    %c0_6 = arith.constant 0 : index
    %c0_7 = arith.constant 0 : index
    %10 = vector.load %arg3[%c0_6, %c0_7] : memref<8x2xf32, #tpu.memory_space<vmem>>, vector<8x2xf32>
    %11 = vector.broadcast %5 : vector<8x1xf32> to vector<8x2xf32>
    %12 = arith.mulf %11, %10 : vector<8x2xf32>
    %c0_8 = arith.constant 0 : index
    %c0_9 = arith.constant 0 : index
    %13 = vector.load %arg4[%c0_8, %c0_9] : memref<8x2xf32, #tpu.memory_space<vmem>>, vector<8x2xf32>
    %14 = vector.broadcast %9 : vector<8x1xf32> to vector<8x2xf32>
    %15 = arith.mulf %14, %13 : vector<8x2xf32>
    %16 = arith.addf %12, %15 : vector<8x2xf32>
    %c0_10 = arith.constant 0 : index
    %c0_11 = arith.constant 0 : index
    %17 = vector.load %arg5[%c0_10, %c0_11] : memref<2x8xf32, #tpu.memory_space<vmem>>, vector<2x8xf32>
    %cst_12 = arith.constant dense<0.000000e+00> : vector<2x2xf32>
    %18 = tpu.matmul %17, %16, %cst_12 {dimension_numbers = #tpu.dot_dimension_numbers<[1], [0], [0], [1], [0, 0, 1, 1], [], []>} : vector<2x8xf32>, vector<8x2xf32>, vector<2x2xf32> -> vector<2x2xf32>
    %c0_13 = arith.constant 0 : index
    %c0_14 = arith.constant 0 : index
    %19 = vector.load %arg8[%c0_13, %c0_14] : memref<1x2xf32, #tpu.memory_space<vmem>>, vector<1x2xf32>
    %20 = vector.broadcast %19 : vector<1x2xf32> to vector<2x2xf32>
    %21 = arith.addf %18, %20 : vector<2x2xf32>
    %cst_15 = arith.constant 0.000000e+00 : f32
    %22 = vector.broadcast %cst_15 : f32 to vector<2x2xf32>
    %23 = arith.maximumf %21, %22 : vector<2x2xf32>
    %c0_16 = arith.constant 0 : index
    %c0_17 = arith.constant 0 : index
    %24 = vector.load %arg9[%c0_16, %c0_17] : memref<2x4xf32, #tpu.memory_space<vmem>>, vector<2x4xf32>
    %cst_18 = arith.constant dense<0.000000e+00> : vector<2x4xf32>
    %25 = tpu.matmul %23, %24, %cst_18 {dimension_numbers = #tpu.dot_dimension_numbers<[1], [0], [0], [1], [0, 0, 1, 1], [], []>} : vector<2x2xf32>, vector<2x4xf32>, vector<2x4xf32> -> vector<2x4xf32>
    %c0_19 = arith.constant 0 : index
    %c0_20 = arith.constant 0 : index
    %26 = vector.load %arg10[%c0_19, %c0_20] : memref<1x4xf32, #tpu.memory_space<vmem>>, vector<1x4xf32>
    %27 = vector.broadcast %26 : vector<1x4xf32> to vector<2x4xf32>
    %28 = arith.addf %25, %27 : vector<2x4xf32>
    %29 = arith.negf %28 : vector<2x4xf32>
    %30 = math.exp %29 : vector<2x4xf32>
    %cst_21 = arith.constant 1.000000e+00 : f32
    %31 = vector.broadcast %cst_21 : f32 to vector<2x4xf32>
    %32 = arith.addf %31, %30 : vector<2x4xf32>
    %33 = arith.divf %31, %32 : vector<2x4xf32>
    %c0_22 = arith.constant 0 : index
    %c0_23 = arith.constant 0 : index
    %34 = vector.load %arg6[%c0_22, %c0_23] : memref<8x2xf32, #tpu.memory_space<vmem>>, vector<8x2xf32>
    %cst_24 = arith.constant dense<0.000000e+00> : vector<8x4xf32>
    %35 = tpu.matmul %34, %33, %cst_24 {dimension_numbers = #tpu.dot_dimension_numbers<[1], [0], [0], [1], [0, 0, 1, 1], [], []>} : vector<8x2xf32>, vector<2x4xf32>, vector<8x4xf32> -> vector<8x4xf32>
    %c0_25 = arith.constant 0 : index
    %c0_26 = arith.constant 0 : index
    %36 = vector.load %arg7[%c0_25, %c0_26] : memref<8x4xf32, #tpu.memory_space<vmem>>, vector<8x4xf32>
    %37 = arith.mulf %35, %36 : vector<8x4xf32>
    %cst_27 = arith.constant dense<0.000000e+00> : vector<8xf32>
    %38 = vector.multi_reduction <add>, %37, %cst_27 [1] : vector<8x4xf32> to vector<8xf32>
    %39 = vector.shape_cast %38 : vector<8xf32> to vector<8x1xf32>
    %40 = vector.broadcast %39 : vector<8x1xf32> to vector<8x256xf32>
    %41 = arith.mulf %0, %40 : vector<8x256xf32>
    %42 = arith.addf %41, %1 : vector<8x256xf32>
    %c0_28 = arith.constant 0 : index
    %c0_29 = arith.constant 0 : index
    %43 = vector.load %arg11[%c0_28, %c0_29] : memref<8x256xf32, #tpu.memory_space<vmem>>, vector<8x256xf32>
    tpu.vector_store %arg11[%c0_28, %c0_29], %42 {strides = array<i32>} : memref<8x256xf32, #tpu.memory_space<vmem>>, vector<8x256xf32>,
    return
  }
  func.func @transform_0(%arg0: i32) -> (i32, i32) {
    %c0_i32 = arith.constant 0 : i32
    %c0_i32_0 = arith.constant 0 : i32
    return %arg0, %c0_i32 : i32, i32
  }
  func.func @transform_1(%arg0: i32) -> (i32, i32) {
    %c0_i32 = arith.constant 0 : i32
    %c0_i32_0 = arith.constant 0 : i32
    return %arg0, %c0_i32 : i32, i32
  }
  func.func @transform_2(%arg0: i32) -> (i32, i32) {
    %c0_i32 = arith.constant 0 : i32
    %c0_i32_0 = arith.constant 0 : i32
    %c0_i32_1 = arith.constant 0 : i32
    return %c0_i32, %c0_i32_0 : i32, i32
  }
  func.func @transform_3(%arg0: i32) -> (i32, i32) {
    %c0_i32 = arith.constant 0 : i32
    %c0_i32_0 = arith.constant 0 : i32
    %c0_i32_1 = arith.constant 0 : i32
    return %c0_i32, %c0_i32_0 : i32, i32
  }
  func.func @transform_4(%arg0: i32) -> (i32, i32) {
    %c0_i32 = arith.constant 0 : i32
    %c0_i32_0 = arith.constant 0 : i32
    %c0_i32_1 = arith.constant 0 : i32
    return %c0_i32, %c0_i32_0 : i32, i32
  }
  func.func @transform_5(%arg0: i32) -> (i32, i32) {
    %c0_i32 = arith.constant 0 : i32
    %c0_i32_0 = arith.constant 0 : i32
    %c0_i32_1 = arith.constant 0 : i32
    return %c0_i32, %c0_i32_0 : i32, i32
  }
  func.func @transform_6(%arg0: i32) -> (i32, i32) {
    %c0_i32 = arith.constant 0 : i32
    %c0_i32_0 = arith.constant 0 : i32
    %c0_i32_1 = arith.constant 0 : i32
    return %c0_i32, %c0_i32_0 : i32, i32
  }
  func.func @transform_7(%arg0: i32) -> (i32, i32) {
    %c0_i32 = arith.constant 0 : i32
    %c0_i32_0 = arith.constant 0 : i32
    %c0_i32_1 = arith.constant 0 : i32
    return %c0_i32, %c0_i32_0 : i32, i32
  }
  func.func @transform_8(%arg0: i32) -> (i32, i32) {
    %c0_i32 = arith.constant 0 : i32
    %c0_i32_0 = arith.constant 0 : i32
    %c0_i32_1 = arith.constant 0 : i32
    return %c0_i32, %c0_i32_0 : i32, i32
  }
  func.func @transform_9(%arg0: i32) -> (i32, i32) {
    %c0_i32 = arith.constant 0 : i32
    %c0_i32_0 = arith.constant 0 : i32
    %c0_i32_1 = arith.constant 0 : i32
    return %c0_i32, %c0_i32_0 : i32, i32
  }
  func.func @transform_10(%arg0: i32) -> (i32, i32) {
    %c0_i32 = arith.constant 0 : i32
    %c0_i32_0 = arith.constant 0 : i32
    return %arg0, %c0_i32 : i32, i32
  }
}

</mosaic_0001>

<bundles_post_ra>
// kernel: tpu_custom_call.1
= control target key start
LH: loop header
LB: loop body
LE: loop exit
PB: predicated region body
PF: predicated region fallthrough
CT: control target
= control target key end

     0   :  { %s355_s0 = inlined_call_operand.vmem [shape: f32[8,256], index: 0, kind: input, shape index: {}]   ;;  %s356_s1 = inlined_call_operand.vmem [shape: f32[8,256], index: 1, kind: input, shape index: {}]   ;;  %s357_s2 = inlined_call_operand.vmem [shape: f32[8,2], index: 2, kind: input, shape index: {}]   ;;  %s358_s3 = inlined_call_operand.vmem [shape: f32[8,2], index: 3, kind: input, shape index: {}]   ;;  %s359_s4 = inlined_call_operand.vmem [shape: f32[2,8], index: 4, kind: input, shape index: {}]   ;;  %s360_s5 = inlined_call_operand.vmem [shape: f32[8,2], index: 5, kind: input, shape index: {}]   ;;  %s361_s6 = inlined_call_operand.vmem [shape: f32[8,4], index: 6, kind: input, shape index: {}]   ;;  %s362_s7 = inlined_call_operand.vmem [shape: f32[1,2], index: 7, kind: input, shape index: {}]   ;;  %s363_s8 = inlined_call_operand.vmem [shape: f32[2,4], index: 8, kind: input, shape index: {}]   ;;  %s364_s9 = inlined_call_operand.vmem [shape: f32[1,4], index: 9, kind: input, shape index: {}]   ;;  %s365_s10 = inlined_call_operand.hbm [shape: f32[8,256], index: 10, kind: output, shape index: {}]  }
   0x1   :  { %v299_v0 = vld [vmem:[%s355_s0] sm:$0xff]  ;;  %v304_v1 = vld [vmem:[%s355_s0 + $0x8] sm:$0xff] }
   0x2   :  { %v40_v2 = vadd.f32 %v304_v1, %v299_v0 }
   0x3   :  { %15 = vsyncpa [#allocation3], 0  ;;  %v311_v3 = vld [vmem:[%s356_s1] sm:$0xff]  ;;  %v316_v4 = vld [vmem:[%s356_s1 + $0x8] sm:$0xff]  ;;  %v239_v6 = vmov 256.0   ;;  %vm65_vm1 = vcmask 64512  }
   0x4   :  { %41 = vadd.xlane.f32.xlu0 %v40_v2  ;;  %v51_v5 = vadd.f32 %v316_v4, %v311_v3  ;;  %207 = vrcp.f32 %v239_v6  ;;  %v55_v16 = vld [vmem:[%s357_s2] sm:$0xff]  ;;  %vm99_vm2 = vcmask 1041408   ;;  %vm95_vm3 = vcmask 15360   ;;  %s188_s12 = sshll.u32 %s365_s10, 4  ;;  %s189_s12 = int_to_ptr.hbm [resolvable:$true] %s188_s12 }
   0x5   :  { %v57_v17 = vld [vmem:[%s358_s3] sm:$0xff]  ;;  %vm171_vm8 = vcmask 31744  }
   0x6   :  { %v60_v22 = vld [vmem:[%s359_s4] sm:$0x3] }
   0x7   :  { %v90_v23 = vld [vmem:[%s363_s8] sm:$0x3] }
   0x8   :  { %198 = vmatpush.msk.msra.mxu1 %vm99_vm2, %v90_v23  ;;  %v205_v24 = vld [vmem:[%s362_s7] ss:$0 sm:$0xff] }
   0x9   :  { %v206_v28 = vld [vmem:[%s364_s9] ss:$0 sm:$0xff] }
   0xa   :  { %v208_v7 = vpop.eup %207  ;;  %v142_v43 = vld [vmem:[%s360_s5] sm:$0xff]  ;;  %s240_s5 = smov [#allocation2]  }
   0xb   :  { %v44_v8 = vmul.f32 256.0, %v208_v7  ;;  %vm48_vm0 = vweird.f32 %v208_v7  ;;  %v169_v45 = vld [vmem:[%s361_s6] sm:$0xff]  ;;  %s186_s29 = sshll.u32 %s240_s5, 4  ;;  %s187_s29 = int_to_ptr.vmem [resolvable:$true] %s186_s29 }
   0xc   :  { %52 = vadd.xlane.f32.xlu0 %v51_v5 }
   0xd   :  { %v45_v9 = vsub.f32 1.0, %v44_v8 }
   0xf   :  { %v46_v10 = vmul.f32 %v208_v7, %v45_v9 }
  0x11   :  { %v47_v11 = vadd.f32 %v208_v7, %v46_v10 }
  0x13   :  { %v49_v13 = vsel %vm48_vm0, %v208_v7, %v47_v11 }
  0x77   :  { %v42_v12 = vpop.xlane.xlu0 %41 }
  0x78   :  { %v50_v14 = vmul.f32 %v49_v13, %v42_v12 }
  0x7a   :  { %v56_v19 = vmul.f32 %v55_v16, %v50_v14 }
  0x7f   :  { %v53_v15 = vpop.xlane.xlu0 %52 }
  0x80   :  { %v54_v18 = vmul.f32 %v53_v15, %v49_v13 }
  0x82   :  { %v58_v20 = vmul.f32 %v57_v17, %v54_v18 }
  0x84   :  { %v59_v21 = vadd.f32 %v58_v20, %v56_v19 }
  0x86   :  { %84 = vmatpush.msra.mxu0 %v59_v21 }
  0x87   :  { %197 = vmatmul.msk.f32.vlgmr.msra.gmra.mxu0 %vm65_vm1, %v60_v22 }
 0x104   :  { %v86_v25 = vpop.f32.mrf.mxu0 }
 0x105   :  { %v87_v26 = vadd.f32 %v205_v24, %v86_v25 }
 0x107   :  { %v89_v27 = vmax.f32 %v87_v26, 0.0 }
 0x109   :  { %199 = vmatmul.msk.f32.vlgmr.msra.gmra.mxu1 %vm95_vm3, %v89_v27 }
 0x186   :  { %v120_v29 = vpop.f32.mrf.mxu1 }
 0x187   :  { %v121_v30 = vadd.f32 %v206_v28, %v120_v29 }
 0x189   :  { %v200_v31 = vmul.f32 -1.442695, %v121_v30 }
 0x18b   :  { %209 = vpow2.f32 %v200_v31 }
 0x191   :  { %v210_v32 = vpop.eup %209 }
 0x192   :  { %v126_v33 = vadd.f32 1.0, %v210_v32 }
 0x194   :  { %211 = vrcp.f32 %v126_v33  ;;  %v138_v37 = vand.u32 2147483648, %v126_v33  ;;  %v136_v39 = vand.u32 2147483647, %v126_v33  ;;  %vm132_vm5 = vweird.f32 %v126_v33 }
 0x196   :  { %v139_v41 = vor.u32 1.1754944e-38, %v138_v37  ;;  %vm137_vm7 = vcmp.eq.f32.partialorder %v136_v39, 8.507059e+37 }
 0x19a   :  { %v212_v34 = vpop.eup %211 }
 0x19b   :  { %v128_v35 = vmul.f32 %v212_v34, %v126_v33  ;;  %vm133_vm4 = vweird.f32 %v212_v34 }
 0x19c   :  { %vm134_vm6 = vmor %vm132_vm5, %vm133_vm4 }
 0x19d   :  { %v129_v36 = vsub.f32 1.0, %v128_v35 }
 0x19f   :  { %v130_v38 = vmul.f32 %v212_v34, %v129_v36 }
 0x1a1   :  { %v131_v40 = vadd.f32 %v212_v34, %v130_v38 }
 0x1a3   :  { %v135_v42 = vsel %vm134_vm6, %v212_v34, %v131_v40 }
 0x1a4   :  { %v140_v44 = vsel %vm137_vm7, %v139_v41, %v135_v42 }
 0x1a5   :  { %201 = vmatpush.msk.msra.mxu2 %vm99_vm2, %v140_v44 }
 0x1a6   :  { %202 = vmatmul.msk.f32.vlgmr.msra.gmra.mxu2 %vm95_vm3, %v142_v43 }
 0x229   :  { %v166_v46 = vpop.f32.mrf.mxu2 }
 0x22a   :  { %v170_v47 = vmul.f32 %v169_v45, %v166_v46 }
 0x22c   :  { %v172_v48 = vsel %vm171_vm8, %v170_v47, 0.0 }
 0x22d   :  { %173 = vadd.xlane.f32.xlu1 %v172_v48 }
 0x2a0   :  { %v174_v49 = vpop.xlane.xlu1 %173 }
 0x2a1   :  { %v175_v50 = vmul.f32 %v174_v49, %v299_v0  ;;  %v176_v51 = vmul.f32 %v174_v49, %v304_v1 }
 0x2a3   :  { %v177_v52 = vadd.f32 %v175_v50, %v311_v3  ;;  %v178_v53 = vadd.f32 %v176_v51, %v316_v4 }
 0x2a5   :  { %179 = vst [vmem:[#allocation2] sm:$0xff] %v177_v52 }
 0x2a6   :  { %180 = vst [vmem:[#allocation2 + $0x8] sm:$0xff] %v178_v53 }
 0x2a7   :  { %191 = dma.vmem_to_hbm [thread:$0]  %s187_s29, 256, %s189_s12, [#allocation3]  }
 0x2a8   :  { %237 = dma.done.wait [#allocation3], 256  }
 0x2a9   :  { %238 = vsyncadd [#allocation3], 4294967040 }
 0x2aa   :  { %196 = vsyncpa [#allocation3], 1 }

</bundles_post_ra>
